<compile_context>
chip_gen: v5e
topology: v5e:2x2
jax: 0.10.0
libtpu: 0.0.40
codegen_flags: <defaults>
</compile_context>

<pallas_src>
import functools

import numpy as np
import jax
import jax.numpy as jnp
from jax import lax
from jax.experimental import pallas as pl
from jax.experimental.pallas import tpu as pltpu


def _bicubic_weight_matrix(in_size: int, out_size: int, a: float = -0.75) -> np.ndarray:
    """[out_size, in_size] interpolation matrix matching torch bicubic
    (half-pixel coords / align_corners=False, Keys cubic a=-0.75, border clamp)."""
    if out_size == in_size:
        return np.eye(out_size, dtype=np.float32)

    def cubic(d):
        ad = np.abs(d)
        w1 = ((a + 2.0) * ad - (a + 3.0)) * ad * ad + 1.0          # |d| <= 1
        w2 = (((ad - 5.0) * ad + 8.0) * ad - 4.0) * a              # 1 < |d| < 2
        return np.where(ad <= 1.0, w1, np.where(ad < 2.0, w2, 0.0))

    scale = in_size / out_size
    i = np.arange(out_size, dtype=np.float64)
    x = (i + 0.5) * scale - 0.5
    i0 = np.floor(x)
    t = x - i0
    W = np.zeros((out_size, in_size), dtype=np.float64)
    rows = np.arange(out_size)
    for k in range(4):
        idx = np.clip(i0 - 1 + k, 0, in_size - 1).astype(np.int64)
        w = cubic(t + 1.0 - k)
        np.add.at(W, (rows, idx), w)
    return W.astype(np.float32)


def _resize_pad_kernel(img_ref, wh_ref, wwt_ref, out_ref, *scratch, bc, H,
                       max_size, new_h, new_w, pad_top, pad_left, fill,
                       width_first, h_align):
    # img_ref:  (bc*H, W)           bc flattened input images for this step
    # wh_ref:   (max_size, H)       height interpolation matrix, pad rows zeroed
    # wwt_ref:  (W, max_size)       width interpolation matrix^T, pad cols zeroed
    # out_ref:  (bc, max_size, max_size)
    # scratch:  optional (bc*H, max_size) VMEM buffer for the batched width pass
    f32 = jnp.float32
    odt = out_ref.dtype
    tmp_ref = scratch[0] if scratch else None

    # Hoisted lane/sublane mask; only needed for a non-zero fill (zero fill is
    # produced exactly by the zeroed rows/cols of the padded weight matrices).
    need_mask = (fill != 0.0) and (new_h < max_size or new_w < max_size)
    if need_mask:
        rows = lax.broadcasted_iota(jnp.int32, (max_size, max_size), 0)
        cols = lax.broadcasted_iota(jnp.int32, (max_size, max_size), 1)
        inside = ((rows >= pad_top) & (rows < pad_top + new_h)
                  & (cols >= pad_left) & (cols < pad_left + new_w))

    if width_first:
        # One big batched MXU matmul over all bc images for the width pass.
        tmp_ref[...] = jnp.dot(img_ref[...], wwt_ref[...],
                               preferred_element_type=f32).astype(tmp_ref.dtype)

    def body(b, carry):
        off = b * H
        if h_align > 1:
            off = pl.multiple_of(off, h_align)
        if width_first:
            t = tmp_ref[pl.ds(off, H), :]                       # (H, max_size)
            res = jnp.dot(wh_ref[...], t, preferred_element_type=f32)
        else:
            im = img_ref[pl.ds(off, H), :]                      # (H, W)
            t = jnp.dot(wh_ref[...], im, preferred_element_type=f32)
            res = jnp.dot(t.astype(wwt_ref.dtype), wwt_ref[...],
                          preferred_element_type=f32)
        if need_mask:
            res = jnp.where(inside, res, fill)
        out_ref[b] = res.astype(odt)                            # lane-dense full block
        return carry

    lax.fori_loop(0, bc, body, 0, unroll=True)


def resize_max_size(img: jax.Array, max_size: int, fill: float = 0.0,
                    *, bf16_compute: bool = False) -> jax.Array:
    """JAX/Pallas equivalent of ResizeMaxSize.forward for NCHW tensors."""
    N, C, H, W = img.shape
    scale = max_size / float(max(H, W))
    new_h = int(round(H * scale))
    new_w = int(round(W * scale))
    pad_top = (max_size - new_h) // 2
    pad_left = (max_size - new_w) // 2

    # --- dtype handling -------------------------------------------------------
    if img.dtype == jnp.bfloat16:
        compute_dtype = jnp.bfloat16
    else:
        if img.dtype != jnp.float32:
            img = img.astype(jnp.float32)     # TODO(synk): no int clamp/round
        compute_dtype = jnp.bfloat16 if bf16_compute else jnp.float32
    out_dtype = img.dtype                     # f32 stays f32 even with bf16 compute
    itemsize = np.dtype(compute_dtype).itemsize
    out_itemsize = np.dtype(out_dtype).itemsize

    # --- weight matrices with padding folded in ------------------------------
    wh_np = np.zeros((max_size, H), np.float32)
    wh_np[pad_top:pad_top + new_h, :] = _bicubic_weight_matrix(H, new_h)
    wwt_np = np.zeros((W, max_size), np.float32)
    wwt_np[:, pad_left:pad_left + new_w] = _bicubic_weight_matrix(W, new_w).T
    wh = jnp.asarray(wh_np, dtype=compute_dtype)    # (max_size, H)
    wwt = jnp.asarray(wwt_np, dtype=compute_dtype)  # (W, max_size)

    B = N * C
    flat = img.reshape(B * H, W)              # contiguous reshape in the wrapper: free
    if flat.dtype != compute_dtype:
        flat = flat.astype(compute_dtype)

    # --- static matmul-order choice (compile-time FLOP compare) --------------
    cost_wf = H * W * max_size + max_size * H * max_size   # width pass first
    cost_hf = max_size * H * W + max_size * W * max_size   # height pass first
    width_first = cost_wf <= int(1.25 * cost_hf)           # bias toward the batched matmul

    # --- generation-aware VMEM budgeting: pick bc (images per grid step) -----
    try:
        capacity = int(pltpu.get_tpu_info().vmem_capacity_bytes)
    except Exception:
        capacity = 64 << 20                   # conservative fallback (v7x-sized)
    reserve = max(16 << 20, capacity // 5)    # ~48 MiB usable on v7x, ~102 MiB on v5e/v6e
    budget = capacity - reserve

    w_bytes_1 = (max_size * H + W * max_size) * itemsize

    def vmem_needed(d, w_copies):
        return (2 * d * H * W * itemsize                         # input block, dbl-buffered
                + 2 * d * max_size * max_size * out_itemsize     # output block, dbl-buffered
                + (d * H * max_size * itemsize if width_first else 0)  # width-pass scratch
                + w_copies * w_bytes_1                           # weight blocks
                + (1 << 20))                                     # vreg / compiler headroom

    # bc must divide B and keep the (bc*H, W) block sublane-legal.
    candidates = [d for d in range(1, B + 1)
                  if B % d == 0 and ((d * H) % 8 == 0 or d == B)]
    feasible = [d for d in candidates if vmem_needed(d, 1) <= budget]
    if not feasible:
        feasible = [min(candidates)]  # TODO(synk): add H-tiling grid axis for huge images

    def pick(cands):
        if compute_dtype == jnp.bfloat16:     # prefer 16-row sublane packing for bf16
            pref = [d for d in cands if (d * H) % 16 == 0 or d == B]
            if pref:
                cands = pref
        return max(cands)

    bc = pick(feasible)
    if B // bc < 2 and B > 1:
        # Keep grid length >= 2 (pipelining) and prefer an even length so both
        # v7x TensorCores get equal work under the "parallel" grid axis.
        smaller = [d for d in feasible if B // d >= 2]
        if smaller:
            even = [d for d in smaller if (B // d) % 2 == 0]
            bc = pick(even) if even else pick(smaller)
    grid = (B // bc,)

    # vmem_limit: needed + small margin (needed already includes double-buffering);
    # computed with 2 weight copies so the Buffered(1) fallback still fits.
    needed = vmem_needed(bc, 2)
    vmem_limit = int(min(max(needed + (4 << 20), 32 << 20), capacity))

    # --- cost estimate hint for XLA scheduling --------------------------------
    flops = 2 * B * (cost_wf if width_first else cost_hf)
    bytes_accessed = (B * H * W * itemsize
                      + B * max_size * max_size * out_itemsize
                      + w_bytes_1)
    cost = pl.CostEstimate(flops=flops, transcendentals=0,
                           bytes_accessed=bytes_accessed)

    # Largest power-of-two alignment guaranteed for b*H offsets (hint only if true).
    h_align = 1
    while h_align < 8 and H % (h_align * 2) == 0:
        h_align *= 2

    kernel = functools.partial(
        _resize_pad_kernel,
        bc=bc, H=H, max_size=max_size, new_h=new_h, new_w=new_w,
        pad_top=pad_top, pad_left=pad_left, fill=float(fill),
        width_first=width_first, h_align=h_align)

    def _call(single_buffer_weights):
        wkw = {"pipeline_mode": pl.Buffered(1)} if single_buffer_weights else {}
        in_specs = [
            pl.BlockSpec((bc * H, W), lambda g: (g, 0)),
            # Constant-index weight blocks; single-buffered to free VMEM.
            pl.BlockSpec((max_size, H), lambda g: (0, 0), **wkw),
            pl.BlockSpec((W, max_size), lambda g: (0, 0), **wkw),
        ]
        scratch = ([pltpu.VMEM((bc * H, max_size), compute_dtype)]
                   if width_first else [])
        return pl.pallas_call(
            kernel,
            out_shape=jax.ShapeDtypeStruct((B, max_size, max_size), out_dtype),
            grid=grid,
            in_specs=in_specs,
            out_specs=pl.BlockSpec((bc, max_size, max_size), lambda g: (g, 0, 0)),
            scratch_shapes=scratch,
            compiler_params=pltpu.CompilerParams(
                dimension_semantics=("parallel",),
                vmem_limit_bytes=vmem_limit),
            cost_estimate=cost,
        )(flat, wh, wwt)

    try:
        out = _call(True)
    except Exception:
        # Fallback if single-buffered (Buffered(1)) blocks are not supported.
        out = _call(False)

    return out.reshape(N, C, max_size, max_size)


if __name__ == "__main__":
    def ref_resize_pad(x, max_size, fill):
        n, c, h, w = x.shape
        sc = max_size / float(max(h, w))
        nh, nw = int(round(h * sc)), int(round(w * sc))
        pt, plft = (max_size - nh) // 2, (max_size - nw) // 2
        whm = _bicubic_weight_matrix(h, nh)
        wwm = _bicubic_weight_matrix(w, nw)
        resized = np.einsum('nh,bchw,mw->bcnm', whm,
                            np.asarray(x, np.float32), wwm)
        outp = np.full((n, c, max_size, max_size), fill, np.float32)
        outp[:, :, pt:pt + nh, plft:plft + nw] = resized
        return outp

    key = jax.random.PRNGKey(0)

    # Case 1: landscape (W > H), zero fill, f32 compute.
    N, C, H, W, max_size = 2, 4, 12, 16, 8
    x = jax.random.normal(key, (N, C, H, W), dtype=jnp.float32)
    out = jax.block_until_ready(resize_max_size(x, max_size=max_size, fill=0.0))
    assert out.shape == (N, C, max_size, max_size), out.shape
    np.testing.assert_allclose(np.asarray(out), ref_resize_pad(x, max_size, 0.0),
                               rtol=1e-4, atol=1e-4)

    # Case 2: portrait (H > W), non-zero fill (exercises the lane-mask path).
    N2, C2, H2, W2, ms2 = 2, 3, 16, 12, 8
    x2 = jax.random.normal(jax.random.PRNGKey(1), (N2, C2, H2, W2), dtype=jnp.float32)
    out2 = jax.block_until_ready(resize_max_size(x2, max_size=ms2, fill=1.5))
    np.testing.assert_allclose(np.asarray(out2), ref_resize_pad(x2, ms2, 1.5),
                               rtol=1e-4, atol=1e-4)

    # Case 3: opt-in bf16 compute path (loose tolerance by design).
    out3 = jax.block_until_ready(resize_max_size(x, max_size=max_size, fill=0.0,
                                                 bf16_compute=True))
    np.testing.assert_allclose(np.asarray(out3), ref_resize_pad(x, max_size, 0.0),
                               rtol=0.1, atol=0.1)

    print("KERNEL_OK")
</pallas_src>

<mosaic_0001>
module attributes {stable_mosaic.version = 11 : i64} {
  func.func @_resize_pad_kernel(%arg0: i32, %arg1: memref<48x16xf32, #tpu.memory_space<vmem>>, %arg2: memref<8x12xf32, #tpu.memory_space<vmem>>, %arg3: memref<16x8xf32, #tpu.memory_space<vmem>>, %arg4: memref<4x8x8xf32, #tpu.memory_space<vmem>>, %arg5: memref<48x8xf32, #tpu.memory_space<vmem>>) attributes {dimension_semantics = [#tpu.dimension_semantics<parallel>], iteration_bounds = array<i64: 2>, scalar_prefetch = 0 : i64, scratch_operands = 1 : i64, tpu.core_type = #tpu.core_type<tc>, window_params = [{transform_indices = @transform_0, window_bounds = array<i64: 48, 16>}, {pipeline_mode = #tpu.pipeline_mode<synchronous>, transform_indices = @transform_1, window_bounds = array<i64: 8, 12>}, {pipeline_mode = #tpu.pipeline_mode<synchronous>, transform_indices = @transform_2, window_bounds = array<i64: 16, 8>}, {transform_indices = @transform_3, window_bounds = array<i64: 4, 8, 8>}]} {
    %c0 = arith.constant 0 : index
    %c0_0 = arith.constant 0 : index
    %0 = vector.load %arg1[%c0, %c0_0] : memref<48x16xf32, #tpu.memory_space<vmem>>, vector<48x16xf32>
    %c0_1 = arith.constant 0 : index
    %c0_2 = arith.constant 0 : index
    %1 = vector.load %arg3[%c0_1, %c0_2] : memref<16x8xf32, #tpu.memory_space<vmem>>, vector<16x8xf32>
    %cst = arith.constant dense<0.000000e+00> : vector<48x8xf32>
    %2 = tpu.matmul %0, %1, %cst {dimension_numbers = #tpu.dot_dimension_numbers<[1], [0], [0], [1], [0, 0, 1, 1], [], []>} : vector<48x16xf32>, vector<16x8xf32>, vector<48x8xf32> -> vector<48x8xf32>
    %c0_3 = arith.constant 0 : index
    %c0_4 = arith.constant 0 : index
    %3 = vector.load %arg5[%c0_3, %c0_4] : memref<48x8xf32, #tpu.memory_space<vmem>>, vector<48x8xf32>
    tpu.vector_store %arg5[%c0_3, %c0_4], %2 {strides = array<i32>} : memref<48x8xf32, #tpu.memory_space<vmem>>, vector<48x8xf32>,
    %c0_i32 = arith.constant 0 : i32
    %c12_i32 = arith.constant 12 : i32
    %4 = arith.muli %c0_i32, %c12_i32 : i32
    %5 = tpu.assume_multiple %4, 4 : i32
    %6 = arith.index_cast %5 : i32 to index
    %c0_5 = arith.constant 0 : index
    %7 = vector.load %arg5[%6, %c0_5] : memref<48x8xf32, #tpu.memory_space<vmem>>, vector<12x8xf32>
    %c0_6 = arith.constant 0 : index
    %c0_7 = arith.constant 0 : index
    %8 = vector.load %arg2[%c0_6, %c0_7] : memref<8x12xf32, #tpu.memory_space<vmem>>, vector<8x12xf32>
    %cst_8 = arith.constant dense<0.000000e+00> : vector<8x8xf32>
    %9 = tpu.matmul %8, %7, %cst_8 {dimension_numbers = #tpu.dot_dimension_numbers<[1], [0], [0], [1], [0, 0, 1, 1], [], []>} : vector<8x12xf32>, vector<12x8xf32>, vector<8x8xf32> -> vector<8x8xf32>
    %10 = arith.index_cast %c0_i32 : i32 to index
    %c0_9 = arith.constant 0 : index
    %c0_10 = arith.constant 0 : index
    %11 = vector.load %arg4[%10, %c0_9, %c0_10] : memref<4x8x8xf32, #tpu.memory_space<vmem>>, vector<1x8x8xf32>
    %12 = vector.shape_cast %11 : vector<1x8x8xf32> to vector<8x8xf32>
    %13 = vector.shape_cast %9 : vector<8x8xf32> to vector<1x8x8xf32>
    tpu.vector_store %arg4[%10, %c0_9, %c0_10], %13 {strides = array<i32>} : memref<4x8x8xf32, #tpu.memory_space<vmem>>, vector<1x8x8xf32>,
    %c1_i32 = arith.constant 1 : i32
    %c12_i32_11 = arith.constant 12 : i32
    %14 = arith.muli %c1_i32, %c12_i32_11 : i32
    %15 = tpu.assume_multiple %14, 4 : i32
    %16 = arith.index_cast %15 : i32 to index
    %c0_12 = arith.constant 0 : index
    %17 = vector.load %arg5[%16, %c0_12] : memref<48x8xf32, #tpu.memory_space<vmem>>, vector<12x8xf32>
    %c0_13 = arith.constant 0 : index
    %c0_14 = arith.constant 0 : index
    %18 = vector.load %arg2[%c0_13, %c0_14] : memref<8x12xf32, #tpu.memory_space<vmem>>, vector<8x12xf32>
    %cst_15 = arith.constant dense<0.000000e+00> : vector<8x8xf32>
    %19 = tpu.matmul %18, %17, %cst_15 {dimension_numbers = #tpu.dot_dimension_numbers<[1], [0], [0], [1], [0, 0, 1, 1], [], []>} : vector<8x12xf32>, vector<12x8xf32>, vector<8x8xf32> -> vector<8x8xf32>
    %20 = arith.index_cast %c1_i32 : i32 to index
    %c0_16 = arith.constant 0 : index
    %c0_17 = arith.constant 0 : index
    %21 = vector.load %arg4[%20, %c0_16, %c0_17] : memref<4x8x8xf32, #tpu.memory_space<vmem>>, vector<1x8x8xf32>
    %22 = vector.shape_cast %21 : vector<1x8x8xf32> to vector<8x8xf32>
    %23 = vector.shape_cast %19 : vector<8x8xf32> to vector<1x8x8xf32>
    tpu.vector_store %arg4[%20, %c0_16, %c0_17], %23 {strides = array<i32>} : memref<4x8x8xf32, #tpu.memory_space<vmem>>, vector<1x8x8xf32>,
    %c2_i32 = arith.constant 2 : i32
    %c12_i32_18 = arith.constant 12 : i32
    %24 = arith.muli %c2_i32, %c12_i32_18 : i32
    %25 = tpu.assume_multiple %24, 4 : i32
    %26 = arith.index_cast %25 : i32 to index
    %c0_19 = arith.constant 0 : index
    %27 = vector.load %arg5[%26, %c0_19] : memref<48x8xf32, #tpu.memory_space<vmem>>, vector<12x8xf32>
    %c0_20 = arith.constant 0 : index
    %c0_21 = arith.constant 0 : index
    %28 = vector.load %arg2[%c0_20, %c0_21] : memref<8x12xf32, #tpu.memory_space<vmem>>, vector<8x12xf32>
    %cst_22 = arith.constant dense<0.000000e+00> : vector<8x8xf32>
    %29 = tpu.matmul %28, %27, %cst_22 {dimension_numbers = #tpu.dot_dimension_numbers<[1], [0], [0], [1], [0, 0, 1, 1], [], []>} : vector<8x12xf32>, vector<12x8xf32>, vector<8x8xf32> -> vector<8x8xf32>
    %30 = arith.index_cast %c2_i32 : i32 to index
    %c0_23 = arith.constant 0 : index
    %c0_24 = arith.constant 0 : index
    %31 = vector.load %arg4[%30, %c0_23, %c0_24] : memref<4x8x8xf32, #tpu.memory_space<vmem>>, vector<1x8x8xf32>
    %32 = vector.shape_cast %31 : vector<1x8x8xf32> to vector<8x8xf32>
    %33 = vector.shape_cast %29 : vector<8x8xf32> to vector<1x8x8xf32>
    tpu.vector_store %arg4[%30, %c0_23, %c0_24], %33 {strides = array<i32>} : memref<4x8x8xf32, #tpu.memory_space<vmem>>, vector<1x8x8xf32>,
    %c3_i32 = arith.constant 3 : i32
    %c12_i32_25 = arith.constant 12 : i32
    %34 = arith.muli %c3_i32, %c12_i32_25 : i32
    %35 = tpu.assume_multiple %34, 4 : i32
    %36 = arith.index_cast %35 : i32 to index
    %c0_26 = arith.constant 0 : index
    %37 = vector.load %arg5[%36, %c0_26] : memref<48x8xf32, #tpu.memory_space<vmem>>, vector<12x8xf32>
    %c0_27 = arith.constant 0 : index
    %c0_28 = arith.constant 0 : index
    %38 = vector.load %arg2[%c0_27, %c0_28] : memref<8x12xf32, #tpu.memory_space<vmem>>, vector<8x12xf32>
    %cst_29 = arith.constant dense<0.000000e+00> : vector<8x8xf32>
    %39 = tpu.matmul %38, %37, %cst_29 {dimension_numbers = #tpu.dot_dimension_numbers<[1], [0], [0], [1], [0, 0, 1, 1], [], []>} : vector<8x12xf32>, vector<12x8xf32>, vector<8x8xf32> -> vector<8x8xf32>
    %40 = arith.index_cast %c3_i32 : i32 to index
    %c0_30 = arith.constant 0 : index
    %c0_31 = arith.constant 0 : index
    %41 = vector.load %arg4[%40, %c0_30, %c0_31] : memref<4x8x8xf32, #tpu.memory_space<vmem>>, vector<1x8x8xf32>
    %42 = vector.shape_cast %41 : vector<1x8x8xf32> to vector<8x8xf32>
    %43 = vector.shape_cast %39 : vector<8x8xf32> to vector<1x8x8xf32>
    tpu.vector_store %arg4[%40, %c0_30, %c0_31], %43 {strides = array<i32>} : memref<4x8x8xf32, #tpu.memory_space<vmem>>, vector<1x8x8xf32>,
    %c4_i32 = arith.constant 4 : i32
    return
  }
  func.func @transform_0(%arg0: i32) -> (i32, i32) {
    %c0_i32 = arith.constant 0 : i32
    %c0_i32_0 = arith.constant 0 : i32
    return %arg0, %c0_i32 : i32, i32
  }
  func.func @transform_1(%arg0: i32) -> (i32, i32) {
    %c0_i32 = arith.constant 0 : i32
    %c0_i32_0 = arith.constant 0 : i32
    %c0_i32_1 = arith.constant 0 : i32
    return %c0_i32, %c0_i32_0 : i32, i32
  }
  func.func @transform_2(%arg0: i32) -> (i32, i32) {
    %c0_i32 = arith.constant 0 : i32
    %c0_i32_0 = arith.constant 0 : i32
    %c0_i32_1 = arith.constant 0 : i32
    return %c0_i32, %c0_i32_0 : i32, i32
  }
  func.func @transform_3(%arg0: i32) -> (i32, i32, i32) {
    %c0_i32 = arith.constant 0 : i32
    %c0_i32_0 = arith.constant 0 : i32
    %c0_i32_1 = arith.constant 0 : i32
    return %arg0, %c0_i32, %c0_i32_0 : i32, i32, i32
  }
}

module attributes {stable_mosaic.version = 11 : i64} {
  func.func @_resize_pad_kernel(%arg0: i32, %arg1: memref<48x16xf32, #tpu.memory_space<vmem>>, %arg2: memref<8x12xf32, #tpu.memory_space<vmem>>, %arg3: memref<16x8xf32, #tpu.memory_space<vmem>>, %arg4: memref<4x8x8xf32, #tpu.memory_space<vmem>>, %arg5: memref<48x8xf32, #tpu.memory_space<vmem>>) attributes {dimension_semantics = [#tpu.dimension_semantics<parallel>], iteration_bounds = array<i64: 2>, scalar_prefetch = 0 : i64, scratch_operands = 1 : i64, tpu.core_type = #tpu.core_type<tc>, window_params = [{transform_indices = @transform_0, window_bounds = array<i64: 48, 16>}, {pipeline_mode = #tpu.pipeline_mode<synchronous>, transform_indices = @transform_1, window_bounds = array<i64: 8, 12>}, {pipeline_mode = #tpu.pipeline_mode<synchronous>, transform_indices = @transform_2, window_bounds = array<i64: 16, 8>}, {transform_indices = @transform_3, window_bounds = array<i64: 4, 8, 8>}]} {
    %c0 = arith.constant 0 : index
    %c0_0 = arith.constant 0 : index
    %0 = vector.load %arg1[%c0, %c0_0] : memref<48x16xf32, #tpu.memory_space<vmem>>, vector<48x16xf32>
    %c0_1 = arith.constant 0 : index
    %c0_2 = arith.constant 0 : index
    %1 = vector.load %arg3[%c0_1, %c0_2] : memref<16x8xf32, #tpu.memory_space<vmem>>, vector<16x8xf32>
    %cst = arith.constant dense<0.000000e+00> : vector<48x8xf32>
    %2 = tpu.matmul %0, %1, %cst {dimension_numbers = #tpu.dot_dimension_numbers<[1], [0], [0], [1], [0, 0, 1, 1], [], []>} : vector<48x16xf32>, vector<16x8xf32>, vector<48x8xf32> -> vector<48x8xf32>
    %c0_3 = arith.constant 0 : index
    %c0_4 = arith.constant 0 : index
    %3 = vector.load %arg5[%c0_3, %c0_4] : memref<48x8xf32, #tpu.memory_space<vmem>>, vector<48x8xf32>
    tpu.vector_store %arg5[%c0_3, %c0_4], %2 {strides = array<i32>} : memref<48x8xf32, #tpu.memory_space<vmem>>, vector<48x8xf32>,
    %c0_i32 = arith.constant 0 : i32
    %c12_i32 = arith.constant 12 : i32
    %4 = arith.muli %c0_i32, %c12_i32 : i32
    %5 = tpu.assume_multiple %4, 4 : i32
    %6 = arith.index_cast %5 : i32 to index
    %c0_5 = arith.constant 0 : index
    %7 = vector.load %arg5[%6, %c0_5] : memref<48x8xf32, #tpu.memory_space<vmem>>, vector<12x8xf32>
    %c0_6 = arith.constant 0 : index
    %c0_7 = arith.constant 0 : index
    %8 = vector.load %arg2[%c0_6, %c0_7] : memref<8x12xf32, #tpu.memory_space<vmem>>, vector<8x12xf32>
    %cst_8 = arith.constant dense<0.000000e+00> : vector<8x8xf32>
    %9 = tpu.matmul %8, %7, %cst_8 {dimension_numbers = #tpu.dot_dimension_numbers<[1], [0], [0], [1], [0, 0, 1, 1], [], []>} : vector<8x12xf32>, vector<12x8xf32>, vector<8x8xf32> -> vector<8x8xf32>
    %10 = arith.index_cast %c0_i32 : i32 to index
    %c0_9 = arith.constant 0 : index
    %c0_10 = arith.constant 0 : index
    %11 = vector.load %arg4[%10, %c0_9, %c0_10] : memref<4x8x8xf32, #tpu.memory_space<vmem>>, vector<1x8x8xf32>
    %12 = vector.shape_cast %11 : vector<1x8x8xf32> to vector<8x8xf32>
    %13 = vector.shape_cast %9 : vector<8x8xf32> to vector<1x8x8xf32>
    tpu.vector_store %arg4[%10, %c0_9, %c0_10], %13 {strides = array<i32>} : memref<4x8x8xf32, #tpu.memory_space<vmem>>, vector<1x8x8xf32>,
    %c1_i32 = arith.constant 1 : i32
    %c12_i32_11 = arith.constant 12 : i32
    %14 = arith.muli %c1_i32, %c12_i32_11 : i32
    %15 = tpu.assume_multiple %14, 4 : i32
    %16 = arith.index_cast %15 : i32 to index
    %c0_12 = arith.constant 0 : index
    %17 = vector.load %arg5[%16, %c0_12] : memref<48x8xf32, #tpu.memory_space<vmem>>, vector<12x8xf32>
    %c0_13 = arith.constant 0 : index
    %c0_14 = arith.constant 0 : index
    %18 = vector.load %arg2[%c0_13, %c0_14] : memref<8x12xf32, #tpu.memory_space<vmem>>, vector<8x12xf32>
    %cst_15 = arith.constant dense<0.000000e+00> : vector<8x8xf32>
    %19 = tpu.matmul %18, %17, %cst_15 {dimension_numbers = #tpu.dot_dimension_numbers<[1], [0], [0], [1], [0, 0, 1, 1], [], []>} : vector<8x12xf32>, vector<12x8xf32>, vector<8x8xf32> -> vector<8x8xf32>
    %20 = arith.index_cast %c1_i32 : i32 to index
    %c0_16 = arith.constant 0 : index
    %c0_17 = arith.constant 0 : index
    %21 = vector.load %arg4[%20, %c0_16, %c0_17] : memref<4x8x8xf32, #tpu.memory_space<vmem>>, vector<1x8x8xf32>
    %22 = vector.shape_cast %21 : vector<1x8x8xf32> to vector<8x8xf32>
    %23 = vector.shape_cast %19 : vector<8x8xf32> to vector<1x8x8xf32>
    tpu.vector_store %arg4[%20, %c0_16, %c0_17], %23 {strides = array<i32>} : memref<4x8x8xf32, #tpu.memory_space<vmem>>, vector<1x8x8xf32>,
    %c2_i32 = arith.constant 2 : i32
    %c12_i32_18 = arith.constant 12 : i32
    %24 = arith.muli %c2_i32, %c12_i32_18 : i32
    %25 = tpu.assume_multiple %24, 4 : i32
    %26 = arith.index_cast %25 : i32 to index
    %c0_19 = arith.constant 0 : index
    %27 = vector.load %arg5[%26, %c0_19] : memref<48x8xf32, #tpu.memory_space<vmem>>, vector<12x8xf32>
    %c0_20 = arith.constant 0 : index
    %c0_21 = arith.constant 0 : index
    %28 = vector.load %arg2[%c0_20, %c0_21] : memref<8x12xf32, #tpu.memory_space<vmem>>, vector<8x12xf32>
    %cst_22 = arith.constant dense<0.000000e+00> : vector<8x8xf32>
    %29 = tpu.matmul %28, %27, %cst_22 {dimension_numbers = #tpu.dot_dimension_numbers<[1], [0], [0], [1], [0, 0, 1, 1], [], []>} : vector<8x12xf32>, vector<12x8xf32>, vector<8x8xf32> -> vector<8x8xf32>
    %30 = arith.index_cast %c2_i32 : i32 to index
    %c0_23 = arith.constant 0 : index
    %c0_24 = arith.constant 0 : index
    %31 = vector.load %arg4[%30, %c0_23, %c0_24] : memref<4x8x8xf32, #tpu.memory_space<vmem>>, vector<1x8x8xf32>
    %32 = vector.shape_cast %31 : vector<1x8x8xf32> to vector<8x8xf32>
    %33 = vector.shape_cast %29 : vector<8x8xf32> to vector<1x8x8xf32>
    tpu.vector_store %arg4[%30, %c0_23, %c0_24], %33 {strides = array<i32>} : memref<4x8x8xf32, #tpu.memory_space<vmem>>, vector<1x8x8xf32>,
    %c3_i32 = arith.constant 3 : i32
    %c12_i32_25 = arith.constant 12 : i32
    %34 = arith.muli %c3_i32, %c12_i32_25 : i32
    %35 = tpu.assume_multiple %34, 4 : i32
    %36 = arith.index_cast %35 : i32 to index
    %c0_26 = arith.constant 0 : index
    %37 = vector.load %arg5[%36, %c0_26] : memref<48x8xf32, #tpu.memory_space<vmem>>, vector<12x8xf32>
    %c0_27 = arith.constant 0 : index
    %c0_28 = arith.constant 0 : index
    %38 = vector.load %arg2[%c0_27, %c0_28] : memref<8x12xf32, #tpu.memory_space<vmem>>, vector<8x12xf32>
    %cst_29 = arith.constant dense<0.000000e+00> : vector<8x8xf32>
    %39 = tpu.matmul %38, %37, %cst_29 {dimension_numbers = #tpu.dot_dimension_numbers<[1], [0], [0], [1], [0, 0, 1, 1], [], []>} : vector<8x12xf32>, vector<12x8xf32>, vector<8x8xf32> -> vector<8x8xf32>
    %40 = arith.index_cast %c3_i32 : i32 to index
    %c0_30 = arith.constant 0 : index
    %c0_31 = arith.constant 0 : index
    %41 = vector.load %arg4[%40, %c0_30, %c0_31] : memref<4x8x8xf32, #tpu.memory_space<vmem>>, vector<1x8x8xf32>
    %42 = vector.shape_cast %41 : vector<1x8x8xf32> to vector<8x8xf32>
    %43 = vector.shape_cast %39 : vector<8x8xf32> to vector<1x8x8xf32>
    tpu.vector_store %arg4[%40, %c0_30, %c0_31], %43 {strides = array<i32>} : memref<4x8x8xf32, #tpu.memory_space<vmem>>, vector<1x8x8xf32>,
    %c4_i32 = arith.constant 4 : i32
    return
  }
  func.func @transform_0(%arg0: i32) -> (i32, i32) {
    %c0_i32 = arith.constant 0 : i32
    %c0_i32_0 = arith.constant 0 : i32
    return %arg0, %c0_i32 : i32, i32
  }
  func.func @transform_1(%arg0: i32) -> (i32, i32) {
    %c0_i32 = arith.constant 0 : i32
    %c0_i32_0 = arith.constant 0 : i32
    %c0_i32_1 = arith.constant 0 : i32
    return %c0_i32, %c0_i32_0 : i32, i32
  }
  func.func @transform_2(%arg0: i32) -> (i32, i32) {
    %c0_i32 = arith.constant 0 : i32
    %c0_i32_0 = arith.constant 0 : i32
    %c0_i32_1 = arith.constant 0 : i32
    return %c0_i32, %c0_i32_0 : i32, i32
  }
  func.func @transform_3(%arg0: i32) -> (i32, i32, i32) {
    %c0_i32 = arith.constant 0 : i32
    %c0_i32_0 = arith.constant 0 : i32
    %c0_i32_1 = arith.constant 0 : i32
    return %arg0, %c0_i32, %c0_i32_0 : i32, i32, i32
  }
}

</mosaic_0001>

<bundles_post_ra>
// kernel: tpu_custom_call.1
= control target key start
LH: loop header
LB: loop body
LE: loop exit
PB: predicated region body
PF: predicated region fallthrough
CT: control target
= control target key end

     0   :  { %8 = vsyncpa [#allocation4], 0  ;;  %s714_s0 = inlined_call_operand.vmem [shape: f32[96,16], index: 0, kind: input, shape index: {}]   ;;  %s715_s1 = inlined_call_operand.vmem [shape: f32[8,12], index: 1, kind: input, shape index: {}]   ;;  %s716_s2 = inlined_call_operand.vmem [shape: f32[16,8], index: 2, kind: input, shape index: {}]   ;;  %s717_s3 = inlined_call_operand.hbm [shape: f32[8,8,8], index: 3, kind: output, shape index: {}]  }
   0x1   :  { %10 = vsyncpa [#allocation4 + $0x1], 0  ;;  %s607_s12 = smov 0   ;;  %s609_s13 = smov 0  }
   0x2   :  { %s611_s14 = smov 0   ;;  %s613_s15 = smov 0  }
   0x3 LB: > { %s628_s16 = sadd.s32 4294967295, %s583_s15   ;;  %s447_s17 = sadd.s32 4294967294, %s583_s15   ;;  %s583_s15 = sphi %s613_s15, %s723_s15   ;;  %s579_s14 = sphi %s611_s14, %s722_s14   ;;  %s575_s13 = sphi %s609_s13, %s721_s13   ;;  %s571_s12 = sphi %s607_s12, %s720_s12  }
   0x4   : > { %s632_s18 = sadd.s32 1, %s583_s15   ;;  %s91_s19 = sadd.s32 1, %s579_s14 }
   0x5   : > { %s88_s20 = ssub.s32 %s583_s15, %s632_s18  ;;  %p101_p0 = scmp.ne.s32.totalorder %s579_s14, %s575_s13 }
   0x6   : > { %p89_p1 = scmp.eq.s32.totalorder %s88_s20, 0  ;;  %p102_p2 = scmp.eq.s32.totalorder %s628_s16, 1 }
   0x7   : > { %p107_p3 = scmp.ne.s32.totalorder %s575_s13, %s571_s12  ;;  %p108_p4 = scmp.eq.s32.totalorder %s447_s17, 1 }
   0x8   : > { %s643_s21 = scalar_select %p89_p1, %s579_s14, %s91_s19  }
   0x9   : > { %p645_p5 = por %p102_p2, %p101_p0  ;;  %p649_p6 = por %p108_p4, %p107_p3 }
   0xa   : > { %p450_p7 = scmp.ge.s32.totalorder %s583_s15, 1  ;;  %p141_p8 = scmp.lt.s32.totalorder %s583_s15, 3 }
   0xc   : > { %p142_p9 = pnand %p450_p7, %p141_p8 }
   0xd   : > { %s165_s28 = smul.u32 (!%p142_p9), 6, %s628_s16  ;;  %s162_s8 = sand.u32 (!%p142_p9), 1, %s575_s13  }
   0xe   : > { %145 = sbr.rel (%p142_p9) target bundleno = 312 (0x138), region = 32  ;;  %s451_s9 = sshll.u32 (!%p142_p9), %s162_s8, 5 }
   0xf   : > { %p166_p10 = scmp.lt.s32.totalorder (!%p142_p9), %s165_s28, 11  ;;  %s164_s10 = scalar_lea.vmem (!%p142_p9), [#allocation3], %s451_s9 }
  0x10   : > { %s475_s11 = sshll.u32 (!%p142_p9), %s628_s16, 5  ;;  %s382_s24 = sshll.u32 (!%p142_p9), %s164_s10, 4  ;;  %s383_s24 = int_to_ptr.vmem [resolvable:$true] %s382_s24 }
  0x11   : > { %s381_s20 = scalar_lea.hbm (!%p142_p9), %s717_s3, %s475_s11  ;;  %s370_s26 = scalar_lea.sflag (!%p142_p9), [#allocation4], %s162_s8 }
  0x12   : > { %s384_s25 = sshll.u32 (!%p142_p9), %s381_s20, 4  ;;  %s541_s30 = scalar_lea.hbm (!%p142_p9), %s717_s3, 64  ;;  %s385_s25 = int_to_ptr.hbm [resolvable:$true] %s384_s25 }
  0x13   : > { %v179_v0 = vld [vmem:[%s716_s2 + $0x8] sm:$0xff]  ;;  %v178_v1 = vld [vmem:[%s716_s2] sm:$0xff]  ;;  %s725_s28 = smov (!%p166_p10, %s165_s28), 11  ;;  %vm180_vm0 = vcmask 130048   ;;  %vm234_vm1 = vcmask 64512   ;;  %vm248_vm2 = vcmask 1043456  }
  0x14   : > { %213 = vmatpush.msra.mxu0 %v179_v0  ;;  %477 = vmatpush.msra.mxu3 %v179_v0  ;;  %s452_s29 = sshll.u32 %s725_s28, 3  ;;  %v243_v17 = vld [vmem:[%s715_s1] sm:$0xff]  ;;  %vm244_vm3 = vcmask 97280   ;;  %s535_s16 = sshra.s32 %s385_s25, 4  ;;  %s536_s16 = int_to_ptr.hbm [resolvable:$true] %s535_s16 }
  0x15   : > { %476 = vmatpush.msra.mxu2 %v179_v0  ;;  %s169_s5 = scalar_lea.vmem %s714_s0, %s452_s29  ;;  %s537_s27 = scalar_lea.hbm %s536_s16, 32 }
  0x16   : > { %214 = vmatpush.msra.mxu0 %v178_v1  ;;  %479 = vmatpush.msra.mxu3 %v178_v1  ;;  %v172_v2 = vld [vmem:[%s169_s5] sm:$0xff]  ;;  %v175_v4 = vld [vmem:[%s169_s5 + $0x18] sm:$0xff]  ;;  %v173_v5 = vld [vmem:[%s169_s5 + $0x8] sm:$0xff]  ;;  %p538_p11 = scmp.ne.s32.totalorder %s536_s16, %s537_s27  ;;  %p542_p0 = scmp.lt.s32.totalorder %s536_s16, %s717_s3 }
  0x17   : > { %478 = vmatpush.msra.mxu2 %v178_v1  ;;  %v176_v3 = vld [vmem:[%s169_s5 + $0x20] sm:$0xff]  ;;  %453 = vmatmul.msk.f32.vlgmr.msra.gmra.mxu0 %vm180_vm0, %v172_v2  ;;  %v177_v6 = vld [vmem:[%s169_s5 + $0x28] sm:$0xff]  ;;  %v174_v7 = vld [vmem:[%s169_s5 + $0x10] sm:$0xff]  ;;  %p543_p1 = scmp.lt.s32.totalorder %s541_s30, %s537_s27 }
  0x18   : > { %457 = vmatmul.msk.f32.vlgmr.msra.gmra.mxu3 %vm180_vm0, %v176_v3  ;;  %456 = vmatmul.msk.f32.vlgmr.msra.gmra.mxu2 %vm180_vm0, %v175_v4  ;;  %p539_p12 = pnand %p538_p11, %p645_p5 }
  0x19   : > { %p544_p2 = por %p543_p1, %p542_p0 }
  0x1a   : > { %p540_p13 = pneg %p539_p12 }
  0x1c   : > { %p545_p3 = pnand %p544_p2, %p540_p13 }
  0x1f   : > { %454 = vmatmul.msk.f32.gmra.mxu0 %vm180_vm0, %v173_v5 }
  0x20   : > { %458 = vmatmul.msk.f32.gmra.mxu3 %vm180_vm0, %v177_v6 }
  0x27   : > { %455 = vmatmul.msk.f32.gmra.mxu0 %vm180_vm0, %v174_v7 }
  0x94   : > { %v216_v8 = vpop.f32.mrf.mxu0 }
  0x95   : > { %235 = vst.msk [vmem:[#allocation2] sm:$0xff] %vm234_vm1, %v216_v8 }
  0x9b   : > { %v228_v9 = vpop.f32.mrf.mxu3  ;;  %v225_v10 = vpop.f32.mrf.mxu2 }
  0x9c   : > { %239 = vst.msk [vmem:[#allocation2 + $0x20] sm:$0xff] %vm234_vm1, %v228_v9  ;;  %v219_v11 = vpop.f32.mrf.mxu0  ;;  %v241_v18 = vld [vmem:[#allocation2] sm:$0xff] }
  0x9d   : > { %238 = vst.msk [vmem:[#allocation2 + $0x18] sm:$0xff] %vm234_vm1, %v225_v10 }
  0x9e   : > { %236 = vst.msk [vmem:[#allocation2 + $0x8] sm:$0xff] %vm234_vm1, %v219_v11 }
  0xa3   : > { %v231_v12 = vpop.f32.mrf.mxu3  ;;  %v307_v13 = vld [vmem:[#allocation2 + $0x20] sm:$0xf] }
  0xa4   : > { %240 = vst.msk [vmem:[#allocation2 + $0x28] sm:$0xff] %vm234_vm1, %v231_v12  ;;  %464 = vmatpush.msk.msrb.mxu3 %vm248_vm2, %v307_v13  ;;  %v306_v14 = vld [vmem:[#allocation2 + $0x18] sm:$0xff]  ;;  %v222_v15 = vpop.f32.mrf.mxu0 }
  0xa5   : > { %v242_v16 = vld [vmem:[#allocation2 + $0x8] sm:$0xf]  ;;  %237 = vst.msk [vmem:[#allocation2 + $0x10] sm:$0xff] %vm234_vm1, %v222_v15 }
  0xa6   : > { %459 = vmatpush.msk.msra.mxu1 %vm248_vm2, %v242_v16  ;;  %330 = vmatpush.msrb.mxu3 %v306_v14 }
  0xa7   : > { %465 = vmatmul.msk.f32.vlgmr.msrb.gmra.mxu3 %vm244_vm3, %v243_v17 }
  0xa8   : > { %267 = vmatpush.msra.mxu1 %v241_v18 }
  0xa9   : > { %460 = vmatmul.msk.f32.vlgmr.msra.gmra.mxu1 %vm244_vm3, %v243_v17 }
  0xab   : > { %v339_v19 = vld [vmem:[#allocation2 + $0x2c] sm:$0xf]  ;;  %v338_v21 = vld [vmem:[#allocation2 + $0x24] sm:$0xff] }
  0xac   : > { %467 = vmatpush.msk.msrb.mxu1 %vm248_vm2, %v339_v19  ;;  %v275_v20 = vld [vmem:[#allocation2 + $0x14] sm:$0xf]  ;;  %v274_v22 = vld [vmem:[#allocation2 + $0xc] sm:$0xff] }
  0xad   : > { %461 = vmatpush.msk.msrb.mxu2 %vm248_vm2, %v275_v20 }
  0xae   : > { %362 = vmatpush.msrb.mxu1 %v338_v21 }
  0xaf   : > { %298 = vmatpush.msrb.mxu2 %v274_v22 }
  0xb0   : > { %462 = vmatmul.msk.f32.vlgmr.msrb.gmra.mxu2 %vm244_vm3, %v243_v17 }
  0xb1   : > { %468 = vmatmul.msk.f32.vlgmr.msrb.gmra.mxu1 %vm244_vm3, %v243_v17 }
 0x126   : > { %v269_v23 = vpop.f32.mrf.mxu1 }
 0x127   : > { %272 = vst.msk [vmem:[%s164_s10] sm:$0xff] %vm234_vm1, %v269_v23 }
 0x12a   : > { %v332_v24 = vpop.f32.mrf.mxu3 }
 0x12b   : > { %466 = vst.msk [vmem:[%s164_s10 + $0x10] sm:$0xff] %vm234_vm1, %v332_v24 }
 0x12e   : > { %v364_v25 = vpop.f32.mrf.mxu1 }
 0x12f   : > { %469 = vst.msk [vmem:[%s164_s10 + $0x18] sm:$0xff] %vm234_vm1, %v364_v25 }
 0x133   : > { %v300_v26 = vpop.f32.mrf.mxu2 }
 0x134   : > { %463 = vst.msk [vmem:[%s164_s10 + $0x8] sm:$0xff] %vm234_vm1, %v300_v26 }
 0x135   : > { %548 = shalt.err (!%p545_p3)
}
 0x136   : > { %s585_s6 = smov 128   ;;  %s586_s7 = smov 8  }
 0x137   : > { %480 = dma.vmem_to_hbm [thread:$0]  (%p645_p5), %s383_s24, 512, %s385_s25, %s370_s26, %s585_s6, %s585_s6, %s586_s7  }
 0x138 PF: > { %p486_p4 = scmp.ge.s32.totalorder %s583_s15, 2  ;;  %s399_s8 = sand.u32 1, %s571_s12  }
 0x139   : > { %s400_s9 = scalar_lea.sflag [#allocation4], %s399_s8 }
 0x13a   : > { %p483_p7 = pnand %p486_p4, %p649_p6 }
 0x13c   : > { %p484_p8 = pneg %p483_p7 }
 0x13e   : > { %566 = dma.done.wait (%p484_p8), %s400_s9, 512  }
 0x13f   : > { %568 = vsyncadd (%p484_p8), %s400_s9, 4294966784  ;;  %p13_p9 = scmp.ge.s32.totalorder %s632_s18, 4   ;;  %s720_s12 = smov %s575_s13 }
 0x140   : > { %s721_s13 = smov %s579_s14  ;;  %s722_s14 = smov %s643_s21 }
 0x141   : > { %s723_s15 = smov %s632_s18  ;;  %15 = sbr.rel (!%p13_p9) target bundleno = 3 (0x3), region = 73 }
 0x146   :  { %406 = vsyncpa [#allocation4], 1 }
 0x147   :  { %408 = vsyncpa [#allocation4 + $0x1], 1 }

// kernel: tpu_custom_call.1
= control target key start
LH: loop header
LB: loop body
LE: loop exit
PB: predicated region body
PF: predicated region fallthrough
CT: control target
= control target key end

     0   :  { %8 = vsyncpa [#allocation4], 0  ;;  %s714_s0 = inlined_call_operand.vmem [shape: f32[96,16], index: 0, kind: input, shape index: {}]   ;;  %s715_s1 = inlined_call_operand.vmem [shape: f32[8,12], index: 1, kind: input, shape index: {}]   ;;  %s716_s2 = inlined_call_operand.vmem [shape: f32[16,8], index: 2, kind: input, shape index: {}]   ;;  %s717_s3 = inlined_call_operand.hbm [shape: f32[8,8,8], index: 3, kind: output, shape index: {}]  }
   0x1   :  { %10 = vsyncpa [#allocation4 + $0x1], 0  ;;  %s607_s12 = smov 0   ;;  %s609_s13 = smov 0  }
   0x2   :  { %s611_s14 = smov 0   ;;  %s613_s15 = smov 0  }
   0x3 LB: > { %s628_s16 = sadd.s32 4294967295, %s583_s15   ;;  %s447_s17 = sadd.s32 4294967294, %s583_s15   ;;  %s583_s15 = sphi %s613_s15, %s723_s15   ;;  %s579_s14 = sphi %s611_s14, %s722_s14   ;;  %s575_s13 = sphi %s609_s13, %s721_s13   ;;  %s571_s12 = sphi %s607_s12, %s720_s12  }
   0x4   : > { %s632_s18 = sadd.s32 1, %s583_s15   ;;  %s91_s19 = sadd.s32 1, %s579_s14 }
   0x5   : > { %s88_s20 = ssub.s32 %s583_s15, %s632_s18  ;;  %p101_p0 = scmp.ne.s32.totalorder %s579_s14, %s575_s13 }
   0x6   : > { %p89_p1 = scmp.eq.s32.totalorder %s88_s20, 0  ;;  %p102_p2 = scmp.eq.s32.totalorder %s628_s16, 1 }
   0x7   : > { %p107_p3 = scmp.ne.s32.totalorder %s575_s13, %s571_s12  ;;  %p108_p4 = scmp.eq.s32.totalorder %s447_s17, 1 }
   0x8   : > { %s643_s21 = scalar_select %p89_p1, %s579_s14, %s91_s19  }
   0x9   : > { %p645_p5 = por %p102_p2, %p101_p0  ;;  %p649_p6 = por %p108_p4, %p107_p3 }
   0xa   : > { %p450_p7 = scmp.ge.s32.totalorder %s583_s15, 1  ;;  %p141_p8 = scmp.lt.s32.totalorder %s583_s15, 3 }
   0xc   : > { %p142_p9 = pnand %p450_p7, %p141_p8 }
   0xd   : > { %s165_s28 = smul.u32 (!%p142_p9), 6, %s628_s16  ;;  %s162_s8 = sand.u32 (!%p142_p9), 1, %s575_s13  }
   0xe   : > { %145 = sbr.rel (%p142_p9) target bundleno = 312 (0x138), region = 32  ;;  %s451_s9 = sshll.u32 (!%p142_p9), %s162_s8, 5 }
   0xf   : > { %p166_p10 = scmp.lt.s32.totalorder (!%p142_p9), %s165_s28, 11  ;;  %s164_s10 = scalar_lea.vmem (!%p142_p9), [#allocation3], %s451_s9 }
  0x10   : > { %s475_s11 = sshll.u32 (!%p142_p9), %s628_s16, 5  ;;  %s382_s24 = sshll.u32 (!%p142_p9), %s164_s10, 4  ;;  %s383_s24 = int_to_ptr.vmem [resolvable:$true] %s382_s24 }
  0x11   : > { %s381_s20 = scalar_lea.hbm (!%p142_p9), %s717_s3, %s475_s11  ;;  %s370_s26 = scalar_lea.sflag (!%p142_p9), [#allocation4], %s162_s8 }
  0x12   : > { %s384_s25 = sshll.u32 (!%p142_p9), %s381_s20, 4  ;;  %s541_s30 = scalar_lea.hbm (!%p142_p9), %s717_s3, 64  ;;  %s385_s25 = int_to_ptr.hbm [resolvable:$true] %s384_s25 }
  0x13   : > { %v179_v0 = vld [vmem:[%s716_s2 + $0x8] sm:$0xff]  ;;  %v178_v1 = vld [vmem:[%s716_s2] sm:$0xff]  ;;  %s725_s28 = smov (!%p166_p10, %s165_s28), 11  ;;  %vm180_vm0 = vcmask 130048   ;;  %vm234_vm1 = vcmask 64512   ;;  %vm248_vm2 = vcmask 1043456  }
  0x14   : > { %213 = vmatpush.msra.mxu0 %v179_v0  ;;  %477 = vmatpush.msra.mxu3 %v179_v0  ;;  %s452_s29 = sshll.u32 %s725_s28, 3  ;;  %v243_v17 = vld [vmem:[%s715_s1] sm:$0xff]  ;;  %vm244_vm3 = vcmask 97280   ;;  %s535_s16 = sshra.s32 %s385_s25, 4  ;;  %s536_s16 = int_to_ptr.hbm [resolvable:$true] %s535_s16 }
  0x15   : > { %476 = vmatpush.msra.mxu2 %v179_v0  ;;  %s169_s5 = scalar_lea.vmem %s714_s0, %s452_s29  ;;  %s537_s27 = scalar_lea.hbm %s536_s16, 32 }
  0x16   : > { %214 = vmatpush.msra.mxu0 %v178_v1  ;;  %479 = vmatpush.msra.mxu3 %v178_v1  ;;  %v172_v2 = vld [vmem:[%s169_s5] sm:$0xff]  ;;  %v175_v4 = vld [vmem:[%s169_s5 + $0x18] sm:$0xff]  ;;  %v173_v5 = vld [vmem:[%s169_s5 + $0x8] sm:$0xff]  ;;  %p538_p11 = scmp.ne.s32.totalorder %s536_s16, %s537_s27  ;;  %p542_p0 = scmp.lt.s32.totalorder %s536_s16, %s717_s3 }
  0x17   : > { %478 = vmatpush.msra.mxu2 %v178_v1  ;;  %v176_v3 = vld [vmem:[%s169_s5 + $0x20] sm:$0xff]  ;;  %453 = vmatmul.msk.f32.vlgmr.msra.gmra.mxu0 %vm180_vm0, %v172_v2  ;;  %v177_v6 = vld [vmem:[%s169_s5 + $0x28] sm:$0xff]  ;;  %v174_v7 = vld [vmem:[%s169_s5 + $0x10] sm:$0xff]  ;;  %p543_p1 = scmp.lt.s32.totalorder %s541_s30, %s537_s27 }
  0x18   : > { %457 = vmatmul.msk.f32.vlgmr.msra.gmra.mxu3 %vm180_vm0, %v176_v3  ;;  %456 = vmatmul.msk.f32.vlgmr.msra.gmra.mxu2 %vm180_vm0, %v175_v4  ;;  %p539_p12 = pnand %p538_p11, %p645_p5 }
  0x19   : > { %p544_p2 = por %p543_p1, %p542_p0 }
  0x1a   : > { %p540_p13 = pneg %p539_p12 }
  0x1c   : > { %p545_p3 = pnand %p544_p2, %p540_p13 }
  0x1f   : > { %454 = vmatmul.msk.f32.gmra.mxu0 %vm180_vm0, %v173_v5 }
  0x20   : > { %458 = vmatmul.msk.f32.gmra.mxu3 %vm180_vm0, %v177_v6 }
  0x27   : > { %455 = vmatmul.msk.f32.gmra.mxu0 %vm180_vm0, %v174_v7 }
  0x94   : > { %v216_v8 = vpop.f32.mrf.mxu0 }
  0x95   : > { %235 = vst.msk [vmem:[#allocation2] sm:$0xff] %vm234_vm1, %v216_v8 }
  0x9b   : > { %v228_v9 = vpop.f32.mrf.mxu3  ;;  %v225_v10 = vpop.f32.mrf.mxu2 }
  0x9c   : > { %239 = vst.msk [vmem:[#allocation2 + $0x20] sm:$0xff] %vm234_vm1, %v228_v9  ;;  %v219_v11 = vpop.f32.mrf.mxu0  ;;  %v241_v18 = vld [vmem:[#allocation2] sm:$0xff] }
  0x9d   : > { %238 = vst.msk [vmem:[#allocation2 + $0x18] sm:$0xff] %vm234_vm1, %v225_v10 }
  0x9e   : > { %236 = vst.msk [vmem:[#allocation2 + $0x8] sm:$0xff] %vm234_vm1, %v219_v11 }
  0xa3   : > { %v231_v12 = vpop.f32.mrf.mxu3  ;;  %v307_v13 = vld [vmem:[#allocation2 + $0x20] sm:$0xf] }
  0xa4   : > { %240 = vst.msk [vmem:[#allocation2 + $0x28] sm:$0xff] %vm234_vm1, %v231_v12  ;;  %464 = vmatpush.msk.msrb.mxu3 %vm248_vm2, %v307_v13  ;;  %v306_v14 = vld [vmem:[#allocation2 + $0x18] sm:$0xff]  ;;  %v222_v15 = vpop.f32.mrf.mxu0 }
  0xa5   : > { %v242_v16 = vld [vmem:[#allocation2 + $0x8] sm:$0xf]  ;;  %237 = vst.msk [vmem:[#allocation2 + $0x10] sm:$0xff] %vm234_vm1, %v222_v15 }
  0xa6   : > { %459 = vmatpush.msk.msra.mxu1 %vm248_vm2, %v242_v16  ;;  %330 = vmatpush.msrb.mxu3 %v306_v14 }
  0xa7   : > { %465 = vmatmul.msk.f32.vlgmr.msrb.gmra.mxu3 %vm244_vm3, %v243_v17 }
  0xa8   : > { %267 = vmatpush.msra.mxu1 %v241_v18 }
  0xa9   : > { %460 = vmatmul.msk.f32.vlgmr.msra.gmra.mxu1 %vm244_vm3, %v243_v17 }
  0xab   : > { %v339_v19 = vld [vmem:[#allocation2 + $0x2c] sm:$0xf]  ;;  %v338_v21 = vld [vmem:[#allocation2 + $0x24] sm:$0xff] }
  0xac   : > { %467 = vmatpush.msk.msrb.mxu1 %vm248_vm2, %v339_v19  ;;  %v275_v20 = vld [vmem:[#allocation2 + $0x14] sm:$0xf]  ;;  %v274_v22 = vld [vmem:[#allocation2 + $0xc] sm:$0xff] }
  0xad   : > { %461 = vmatpush.msk.msrb.mxu2 %vm248_vm2, %v275_v20 }
  0xae   : > { %362 = vmatpush.msrb.mxu1 %v338_v21 }
  0xaf   : > { %298 = vmatpush.msrb.mxu2 %v274_v22 }
  0xb0   : > { %462 = vmatmul.msk.f32.vlgmr.msrb.gmra.mxu2 %vm244_vm3, %v243_v17 }
  0xb1   : > { %468 = vmatmul.msk.f32.vlgmr.msrb.gmra.mxu1 %vm244_vm3, %v243_v17 }
 0x126   : > { %v269_v23 = vpop.f32.mrf.mxu1 }
 0x127   : > { %272 = vst.msk [vmem:[%s164_s10] sm:$0xff] %vm234_vm1, %v269_v23 }
 0x12a   : > { %v332_v24 = vpop.f32.mrf.mxu3 }
 0x12b   : > { %466 = vst.msk [vmem:[%s164_s10 + $0x10] sm:$0xff] %vm234_vm1, %v332_v24 }
 0x12e   : > { %v364_v25 = vpop.f32.mrf.mxu1 }
 0x12f   : > { %469 = vst.msk [vmem:[%s164_s10 + $0x18] sm:$0xff] %vm234_vm1, %v364_v25 }
 0x133   : > { %v300_v26 = vpop.f32.mrf.mxu2 }
 0x134   : > { %463 = vst.msk [vmem:[%s164_s10 + $0x8] sm:$0xff] %vm234_vm1, %v300_v26 }
 0x135   : > { %548 = shalt.err (!%p545_p3)
}
 0x136   : > { %s585_s6 = smov 128   ;;  %s586_s7 = smov 8  }
 0x137   : > { %480 = dma.vmem_to_hbm [thread:$0]  (%p645_p5), %s383_s24, 512, %s385_s25, %s370_s26, %s585_s6, %s585_s6, %s586_s7  }
 0x138 PF: > { %p486_p4 = scmp.ge.s32.totalorder %s583_s15, 2  ;;  %s399_s8 = sand.u32 1, %s571_s12  }
 0x139   : > { %s400_s9 = scalar_lea.sflag [#allocation4], %s399_s8 }
 0x13a   : > { %p483_p7 = pnand %p486_p4, %p649_p6 }
 0x13c   : > { %p484_p8 = pneg %p483_p7 }
 0x13e   : > { %566 = dma.done.wait (%p484_p8), %s400_s9, 512  }
 0x13f   : > { %568 = vsyncadd (%p484_p8), %s400_s9, 4294966784  ;;  %p13_p9 = scmp.ge.s32.totalorder %s632_s18, 4   ;;  %s720_s12 = smov %s575_s13 }
 0x140   : > { %s721_s13 = smov %s579_s14  ;;  %s722_s14 = smov %s643_s21 }
 0x141   : > { %s723_s15 = smov %s632_s18  ;;  %15 = sbr.rel (!%p13_p9) target bundleno = 3 (0x3), region = 73 }
 0x146   :  { %406 = vsyncpa [#allocation4], 1 }
 0x147   :  { %408 = vsyncpa [#allocation4 + $0x1], 1 }

</bundles_post_ra>
